<compile_context>
chip_gen: v5e
topology: v5e:2x2
jax: 0.10.0
libtpu: 0.0.40
codegen_flags: <defaults>
</compile_context>

<pallas_src>
import jax
import jax.numpy as jnp
from jax.experimental import pallas as pl
from jax.experimental.pallas import tpu as pltpu

_MAX_TILE_B = 1024  # batch tile (rows); multiple of 8, sized well under VMEM on all chips


# ----------------------------------------------------------------------------
# Fused kernel:  out_tile = relu(x_tile @ W1' + b1') @ W2_pad + b2_pad
# ----------------------------------------------------------------------------
def _latent_oracle_kernel(x_ref, w1_ref, b1_ref, w2_ref, b2_ref, o_ref):
    w1 = w1_ref[...]                                   # (D, H)  compute dtype
    x = x_ref[...].astype(w1.dtype)                    # in-kernel cast (VPU, free)
    h = jnp.dot(x, w1, preferred_element_type=jnp.float32)
    h = jnp.maximum(h + b1_ref[...], 0.0)              # BN folded; f32 elementwise
    w2 = w2_ref[...]                                   # (H, 128) compute dtype
    o = jnp.dot(h.astype(w2.dtype), w2, preferred_element_type=jnp.float32)
    o_ref[...] = (o + b2_ref[...]).astype(o_ref.dtype)  # lane-dense (TB, 128) store


def latent_oracle_forward(prepared, x, *, n_out=9):
    """x: (B, D) -> (B, n_out) f32.  `prepared` comes from prepare_params()."""
    w1, b1, w2, b2 = prepared
    B, D = x.shape
    Dw, H = w1.shape
    assert D == Dw, (D, Dw)
    NP = w2.shape[1]                                   # lane-padded output width (128)

    TB = B if B <= _MAX_TILE_B else _MAX_TILE_B
    grid = (pl.cdiv(B, TB),)

    flops = 2 * B * D * H + 2 * B * H * NP
    bytes_accessed = (x.size * x.dtype.itemsize
                      + w1.size * w1.dtype.itemsize + b1.size * 4
                      + w2.size * w2.dtype.itemsize + b2.size * 4
                      + B * NP * 4)

    out = pl.pallas_call(
        _latent_oracle_kernel,
        out_shape=jax.ShapeDtypeStruct((B, NP), jnp.float32),
        grid=grid,
        in_specs=[
            pl.BlockSpec((TB, D), lambda i: (i, 0)),   # x: tiled over batch
            pl.BlockSpec((Dw, H), lambda i: (0, 0)),   # W1': VMEM-resident
            pl.BlockSpec((1, H), lambda i: (0, 0)),    # b1': VMEM-resident
            pl.BlockSpec((H, NP), lambda i: (0, 0)),   # W2 (lane-padded): resident
            pl.BlockSpec((1, NP), lambda i: (0, 0)),   # b2 (lane-padded): resident
        ],
        out_specs=pl.BlockSpec((TB, NP), lambda i: (i, 0)),
        compiler_params=pltpu.CompilerParams(
            dimension_semantics=("parallel",),          # shard batch across TCs on v7x
            vmem_limit_bytes=32 * 1024 * 1024,          # safe on v5e/v6e/v7x, >> usage
        ),
        cost_estimate=pl.CostEstimate(flops=flops, transcendentals=0,
                                      bytes_accessed=bytes_accessed),
    )(x, w1, b1, w2, b2)
    return out[:, :n_out]


# ----------------------------------------------------------------------------
# One-time parameter preparation (everything hoisted out of the forward)
# ----------------------------------------------------------------------------
def prepare_params(params, eps=1e-5, compute_dtype=jnp.bfloat16):
    """PyTorch-layout params -> kernel operands.

    Folds eval-mode BatchNorm1d into layer-1 weight/bias:
      relu((x@W1^T + b1) * s + t) == relu(x @ (W1^T * s) + (b1 * s + t))
    and zero-pads the head weight/bias to a 128-lane output.
    """
    f32 = jnp.float32
    w1 = params["w1"].astype(f32).T                    # (D, H)
    b1 = params["b1"].astype(f32)                      # (H,)
    gamma = params["bn_gamma"].astype(f32)
    beta = params["bn_beta"].astype(f32)
    mean = params["bn_mean"].astype(f32)
    var = params["bn_var"].astype(f32)
    scale = gamma / jnp.sqrt(var + eps)                # (H,)
    shift = beta - mean * scale                        # (H,)
    w1f = w1 * scale[None, :]                          # BN folded into weight
    b1f = b1 * scale + shift                           # BN folded into bias

    w2 = params["w2"].astype(f32).T                    # (H, N)
    b2 = params["b2"].astype(f32)                      # (N,)
    H, N = w2.shape
    NP = ((N + 127) // 128) * 128                      # lane-dense output width
    w2p = jnp.zeros((H, NP), f32).at[:, :N].set(w2)
    b2p = jnp.zeros((NP,), f32).at[:N].set(b2)

    # NOTE: b1/b2 could additionally be packed into one operand to save a DMA
    # descriptor; kept separate here for clarity (minor effect).
    return (w1f.astype(compute_dtype),                 # (D, H)
            b1f.reshape(1, -1),                        # (1, H)   f32
            w2p.astype(compute_dtype),                 # (H, 128)
            b2p.reshape(1, -1))                        # (1, 128) f32


# ----------------------------------------------------------------------------
# References
# ----------------------------------------------------------------------------
def reference_forward(params, x, eps=1e-5):
    """Exact PyTorch-semantics (eval-mode BN) reference in f32."""
    h = x @ params["w1"].T + params["b1"]
    h = (h - params["bn_mean"]) / jnp.sqrt(params["bn_var"] + eps)
    h = h * params["bn_gamma"] + params["bn_beta"]
    h = jnp.maximum(h, 0.0)
    return h @ params["w2"].T + params["b2"]


def reference_from_prepared(prepared, x, n_out=9):
    """Same math as the kernel (matched precision) in plain jnp."""
    w1, b1, w2, b2 = prepared
    h = jnp.dot(x.astype(w1.dtype), w1, preferred_element_type=jnp.float32) + b1
    h = jnp.maximum(h, 0.0)
    o = jnp.dot(h.astype(w2.dtype), w2, preferred_element_type=jnp.float32) + b2
    return o[:, :n_out]


def init_params(key, in_features, hidden, out_features=9):
    ks = jax.random.split(key, 8)
    f32 = jnp.float32
    s1 = 1.0 / jnp.sqrt(jnp.asarray(in_features, f32))
    s2 = 1.0 / jnp.sqrt(jnp.asarray(hidden, f32))
    return {
        "w1": s1 * jax.random.normal(ks[0], (hidden, in_features), f32),
        "b1": s1 * jax.random.normal(ks[1], (hidden,), f32),
        "bn_gamma": 1.0 + 0.1 * jax.random.normal(ks[2], (hidden,), f32),
        "bn_beta": 0.1 * jax.random.normal(ks[3], (hidden,), f32),
        "bn_mean": 0.1 * jax.random.normal(ks[4], (hidden,), f32),
        "bn_var": jnp.abs(1.0 + 0.1 * jax.random.normal(ks[5], (hidden,), f32)),
        "w2": s2 * jax.random.normal(ks[6], (out_features, hidden), f32),
        "b2": s2 * jax.random.normal(ks[7], (out_features,), f32),
    }


if __name__ == "__main__":
    root = jax.random.PRNGKey(0)
    kp, kx, kx2 = jax.random.split(root, 3)

    # LatentOracle(feature_multipier=2): LazyLinear infers in_features from x.
    batch, in_features, mul = 8, 16, 2
    hidden = 16 * mul                                   # 32
    params = init_params(kp, in_features, hidden)
    x = jax.random.normal(kx, (batch, in_features), dtype=jnp.float32)

    fwd = jax.jit(latent_oracle_forward, static_argnames=("n_out",))

    # 1) f32 compute path: exact check against PyTorch-semantics reference.
    prep_f32 = prepare_params(params, compute_dtype=jnp.float32)
    out_f32 = jax.block_until_ready(fwd(prep_f32, x))
    assert out_f32.shape == (batch, 9), out_f32.shape
    ref = reference_forward(params, x)
    err = float(jnp.max(jnp.abs(out_f32 - ref)))
    assert err < 1e-4, err

    # 2) bf16 matmul-input path (v6e/v7x MXU-native), f32 accumulation:
    #    tight check vs matched-precision jnp reference, loose sanity vs f32 ref.
    prep_bf16 = prepare_params(params, compute_dtype=jnp.bfloat16)
    out_bf16 = jax.block_until_ready(fwd(prep_bf16, x))
    assert out_bf16.shape == (batch, 9), out_bf16.shape
    err = float(jnp.max(jnp.abs(out_bf16 - reference_from_prepared(prep_bf16, x))))
    assert err < 2e-3, err
    assert float(jnp.max(jnp.abs(out_bf16 - ref))) < 0.1

    # 3) Gridded batch path (B > tile): weights stay VMEM-resident, x/out
    #    blocks pipelined across the grid.
    big_b = 2048
    xb = jax.random.normal(kx2, (big_b, in_features), dtype=jnp.float32)
    out_big = jax.block_until_ready(fwd(prep_bf16, xb))
    assert out_big.shape == (big_b, 9), out_big.shape
    err = float(jnp.max(jnp.abs(out_big - reference_from_prepared(prep_bf16, xb))))
    assert err < 2e-3, err
    assert bool(jnp.all(jnp.isfinite(out_big)))

    print("KERNEL_OK")
</pallas_src>

<mosaic_0001>
module attributes {stable_mosaic.version = 11 : i64} {
  func.func @_latent_oracle_kernel(%arg0: i32, %arg1: memref<8x16xf32, #tpu.memory_space<vmem>>, %arg2: memref<16x32xf32, #tpu.memory_space<vmem>>, %arg3: memref<1x32xf32, #tpu.memory_space<vmem>>, %arg4: memref<32x128xf32, #tpu.memory_space<vmem>>, %arg5: memref<1x128xf32, #tpu.memory_space<vmem>>, %arg6: memref<8x128xf32, #tpu.memory_space<vmem>>) attributes {dimension_semantics = [#tpu.dimension_semantics<parallel>], iteration_bounds = array<i64: 1>, scalar_prefetch = 0 : i64, scratch_operands = 0 : i64, tpu.core_type = #tpu.core_type<tc>, window_params = [{transform_indices = @transform_0, window_bounds = array<i64: 8, 16>}, {pipeline_mode = #tpu.pipeline_mode<synchronous>, transform_indices = @transform_1, window_bounds = array<i64: 16, 32>}, {pipeline_mode = #tpu.pipeline_mode<synchronous>, transform_indices = @transform_2, window_bounds = array<i64: 1, 32>}, {pipeline_mode = #tpu.pipeline_mode<synchronous>, transform_indices = @transform_3, window_bounds = array<i64: 32, 128>}, {pipeline_mode = #tpu.pipeline_mode<synchronous>, transform_indices = @transform_4, window_bounds = array<i64: 1, 128>}, {transform_indices = @transform_5, window_bounds = array<i64: 8, 128>}]} {
    %c0 = arith.constant 0 : index
    %c0_0 = arith.constant 0 : index
    %0 = vector.load %arg2[%c0, %c0_0] : memref<16x32xf32, #tpu.memory_space<vmem>>, vector<16x32xf32>
    %c0_1 = arith.constant 0 : index
    %c0_2 = arith.constant 0 : index
    %1 = vector.load %arg1[%c0_1, %c0_2] : memref<8x16xf32, #tpu.memory_space<vmem>>, vector<8x16xf32>
    %cst = arith.constant dense<0.000000e+00> : vector<8x32xf32>
    %2 = tpu.matmul %1, %0, %cst {dimension_numbers = #tpu.dot_dimension_numbers<[1], [0], [0], [1], [0, 0, 1, 1], [], []>} : vector<8x16xf32>, vector<16x32xf32>, vector<8x32xf32> -> vector<8x32xf32>
    %c0_3 = arith.constant 0 : index
    %c0_4 = arith.constant 0 : index
    %3 = vector.load %arg3[%c0_3, %c0_4] : memref<1x32xf32, #tpu.memory_space<vmem>>, vector<1x32xf32>
    %4 = vector.broadcast %3 : vector<1x32xf32> to vector<8x32xf32>
    %5 = arith.addf %2, %4 : vector<8x32xf32>
    %cst_5 = arith.constant 0.000000e+00 : f32
    %6 = vector.broadcast %cst_5 : f32 to vector<8x32xf32>
    %7 = arith.maximumf %5, %6 : vector<8x32xf32>
    %c0_6 = arith.constant 0 : index
    %c0_7 = arith.constant 0 : index
    %8 = vector.load %arg4[%c0_6, %c0_7] : memref<32x128xf32, #tpu.memory_space<vmem>>, vector<32x128xf32>
    %cst_8 = arith.constant dense<0.000000e+00> : vector<8x128xf32>
    %9 = tpu.matmul %7, %8, %cst_8 {dimension_numbers = #tpu.dot_dimension_numbers<[1], [0], [0], [1], [0, 0, 1, 1], [], []>} : vector<8x32xf32>, vector<32x128xf32>, vector<8x128xf32> -> vector<8x128xf32>
    %c0_9 = arith.constant 0 : index
    %c0_10 = arith.constant 0 : index
    %10 = vector.load %arg5[%c0_9, %c0_10] : memref<1x128xf32, #tpu.memory_space<vmem>>, vector<1x128xf32>
    %11 = vector.broadcast %10 : vector<1x128xf32> to vector<8x128xf32>
    %12 = arith.addf %9, %11 : vector<8x128xf32>
    %c0_11 = arith.constant 0 : index
    %c0_12 = arith.constant 0 : index
    %13 = vector.load %arg6[%c0_11, %c0_12] : memref<8x128xf32, #tpu.memory_space<vmem>>, vector<8x128xf32>
    tpu.vector_store %arg6[%c0_11, %c0_12], %12 {strides = array<i32>} : memref<8x128xf32, #tpu.memory_space<vmem>>, vector<8x128xf32>,
    return
  }
  func.func @transform_0(%arg0: i32) -> (i32, i32) {
    %c0_i32 = arith.constant 0 : i32
    %c0_i32_0 = arith.constant 0 : i32
    return %arg0, %c0_i32 : i32, i32
  }
  func.func @transform_1(%arg0: i32) -> (i32, i32) {
    %c0_i32 = arith.constant 0 : i32
    %c0_i32_0 = arith.constant 0 : i32
    %c0_i32_1 = arith.constant 0 : i32
    return %c0_i32, %c0_i32_0 : i32, i32
  }
  func.func @transform_2(%arg0: i32) -> (i32, i32) {
    %c0_i32 = arith.constant 0 : i32
    %c0_i32_0 = arith.constant 0 : i32
    %c0_i32_1 = arith.constant 0 : i32
    return %c0_i32, %c0_i32_0 : i32, i32
  }
  func.func @transform_3(%arg0: i32) -> (i32, i32) {
    %c0_i32 = arith.constant 0 : i32
    %c0_i32_0 = arith.constant 0 : i32
    %c0_i32_1 = arith.constant 0 : i32
    return %c0_i32, %c0_i32_0 : i32, i32
  }
  func.func @transform_4(%arg0: i32) -> (i32, i32) {
    %c0_i32 = arith.constant 0 : i32
    %c0_i32_0 = arith.constant 0 : i32
    %c0_i32_1 = arith.constant 0 : i32
    return %c0_i32, %c0_i32_0 : i32, i32
  }
  func.func @transform_5(%arg0: i32) -> (i32, i32) {
    %c0_i32 = arith.constant 0 : i32
    %c0_i32_0 = arith.constant 0 : i32
    return %arg0, %c0_i32 : i32, i32
  }
}

</mosaic_0001>

<bundles_post_ra>
// kernel: latent_oracle_forward.1
= control target key start
LH: loop header
LB: loop body
LE: loop exit
PB: predicated region body
PF: predicated region fallthrough
CT: control target
= control target key end

     0   :  { %10 = vsyncpa [#allocation3], 0  ;;  %s358_s0 = inlined_call_operand.hbm [shape: f32[8,16], index: 0, kind: input, shape index: {}]   ;;  %s359_s1 = inlined_call_operand.hbm [shape: f32[16,32], index: 1, kind: input, shape index: {}]   ;;  %s360_s2 = inlined_call_operand.hbm [shape: f32[1,32], index: 2, kind: input, shape index: {}]   ;;  %s361_s3 = inlined_call_operand.hbm [shape: f32[32,128], index: 3, kind: input, shape index: {}]   ;;  %s362_s4 = inlined_call_operand.vmem [shape: f32[1,128], index: 4, kind: input, shape index: {}]   ;;  %s363_s5 = inlined_call_operand.hbm [shape: f32[8,128], index: 5, kind: output, shape index: {}]  }
   0x1   :  { %11 = vsyncpa [#allocation6], 0 }
   0x2   :  { %12 = vsyncpa [#allocation9], 0  ;;  %s29_s20 = sshll.u32 %s359_s1, 4  ;;  %s30_s20 = int_to_ptr.hbm [resolvable:$true] %s29_s20 }
   0x3   :  { %13 = vsyncpa [#allocation4], 0  ;;  %s303_s21 = smov [#allocation5]   ;;  %s19_s25 = sshll.u32 %s358_s0, 4  ;;  %s20_s25 = int_to_ptr.hbm [resolvable:$true] %s19_s25 }
   0x4   :  { %s31_s22 = sshll.u32 %s303_s21, 4  ;;  %s304_s26 = smov 128   ;;  %s32_s22 = int_to_ptr.vmem [resolvable:$true] %s31_s22 }
   0x5   :  { %s305_s27 = smov 8   ;;  %s306_s28 = smov [#allocation2]  }
   0x6   :  { %37 = dma.hbm_to_vmem [thread:$0]  %s30_s20, 256, %s32_s22, [#allocation6], %s304_s26, %s304_s26, %s305_s27  }
   0x7   :  { %s21_s29 = sshll.u32 %s306_s28, 4  ;;  %s43_s7 = sshll.u32 %s360_s2, 4  ;;  %s22_s29 = int_to_ptr.vmem [resolvable:$true] %s21_s29  ;;  %s44_s7 = int_to_ptr.hbm [resolvable:$true] %s43_s7 }
   0x8   :  { %24 = dma.hbm_to_vmem [thread:$0]  %s20_s25, 128, %s22_s29, [#allocation3]  }
   0x9   :  { %s53_s9 = sshll.u32 %s361_s3, 4  ;;  %s307_s10 = smov [#allocation7]   ;;  %s54_s9 = int_to_ptr.hbm [resolvable:$true] %s53_s9 }
   0xa   :  { %s45_s11 = sshll.u32 %s307_s10, 4  ;;  %s308_s0 = smov [#allocation8]   ;;  %s46_s11 = int_to_ptr.vmem [resolvable:$true] %s45_s11 }
   0xb   :  { %48 = dma.hbm_to_vmem [thread:$0]  %s44_s7, 16, %s46_s11, [#allocation6]  }
   0xc   :  { %s55_s12 = sshll.u32 %s308_s0, 4  ;;  %s56_s12 = int_to_ptr.vmem [resolvable:$true] %s55_s12 }
   0xd   :  { %61 = dma.hbm_to_vmem [thread:$0]  %s54_s9, 512, %s56_s12, [#allocation9], %s304_s26, %s304_s26, %s305_s27  }
   0xe   :  { %295 = dma.done.wait [#allocation3], 128  }
   0xf   :  { %296 = vsyncadd [#allocation3], 4294967168 }
  0x10   :  { %297 = dma.done.wait [#allocation6], 272  }
  0x11   :  { %298 = vsyncadd [#allocation6], 4294967024 }
  0x12   :  { %299 = dma.done.wait [#allocation9], 512  }
  0x13   :  { %300 = vsyncadd [#allocation9], 4294966784  ;;  %v81_v0 = vld [vmem:[#allocation5 + $0x8] sm:$0xff]  ;;  %v80_v1 = vld [vmem:[#allocation5] sm:$0xff]  ;;  %vm87_vm0 = vcmask 130048   ;;  %vm120_vm1 = vcmask 261120  }
  0x14   :  { %105 = vmatpush.msra.mxu0 %v81_v0  ;;  %v82_v2 = vld [vmem:[#allocation2] sm:$0xff]  ;;  %v115_v3 = vld [vmem:[#allocation8 + $0x18] sm:$0xff]  ;;  %v114_v4 = vld [vmem:[#allocation8 + $0x10] sm:$0xff]  ;;  %s309_s13 = smov [#allocation10]   ;;  %s152_s17 = sshll.u32 %s363_s5, 4  ;;  %s153_s17 = int_to_ptr.hbm [resolvable:$true] %s152_s17 }
  0x15   :  { %136 = vmatpush.msra.mxu1 %v115_v3  ;;  %v113_v5 = vld [vmem:[#allocation8 + $0x8] sm:$0xff]  ;;  %v112_v6 = vld [vmem:[#allocation8] sm:$0xff]  ;;  %v173_v7 = vld [vmem:[#allocation7] ss:$0 sm:$0xff]  ;;  %s150_s14 = sshll.u32 %s309_s13, 4  ;;  %s151_s14 = int_to_ptr.vmem [resolvable:$true] %s150_s14 }
  0x16   :  { %106 = vmatpush.msra.mxu0 %v80_v1  ;;  %v174_v11 = vld [vmem:[%s362_s4] ss:$0 sm:$0xff] }
  0x17   :  { %164 = vmatmul.msk.f32.vlgmr.msra.gmra.mxu0 %vm87_vm0, %v82_v2  ;;  %137 = vmatpush.msra.mxu1 %v114_v4 }
  0x19   :  { %138 = vmatpush.msra.mxu1 %v113_v5 }
  0x1b   :  { %139 = vmatpush.msra.mxu1 %v112_v6 }
  0x94   :  { %v108_v8 = vpop.f32.mrf.mxu0 }
  0x95   :  { %v109_v9 = vadd.f32 %v173_v7, %v108_v8 }
  0x97   :  { %v111_v10 = vmax.f32 %v109_v9, 0.0 }
  0x99   :  { %165 = vmatmul.msk.f32.vlgmr.msra.gmra.mxu1 %vm120_vm1, %v111_v10 }
 0x116   :  { %v141_v12 = vpop.f32.mrf.mxu1 }
 0x117   :  { %v142_v13 = vadd.f32 %v174_v11, %v141_v12 }
 0x119   :  { %144 = vst [vmem:[#allocation10] sm:$0xff] %v142_v13 }
 0x11a   :  { %155 = dma.vmem_to_hbm [thread:$0]  %s151_s14, 128, %s153_s17, [#allocation4]  }
 0x11b   :  { %301 = dma.done.wait [#allocation4], 128  }
 0x11c   :  { %302 = vsyncadd [#allocation4], 4294967168 }
 0x11d   :  { %160 = vsyncpa [#allocation3], 1 }
 0x11e   :  { %161 = vsyncpa [#allocation6], 1 }
 0x11f   :  { %162 = vsyncpa [#allocation9], 1 }
 0x120   :  { %163 = vsyncpa [#allocation4], 1 }

</bundles_post_ra>
